<compile_context>
chip_gen: v6e
topology: v6e:2x2x1
jax: 0.10.0
libtpu: 0.0.40
codegen_flags: <defaults>
</compile_context>

<pallas_src>
import jax
import jax.numpy as jnp
from jax.experimental import pallas as pl
from jax.experimental.pallas import tpu as pltpu


def _dict_like_kernel(xt_ref, wt_ref, b_ref, o_ref):
    # xt_ref: (d_in_total, TB)   batch in lanes (lane-dense)
    # wt_ref: (out_dim, d_in_total) = [W1^T | 0 ; 0 | W2^T]
    # b_ref : (out_dim, 1)
    # o_ref : (out_dim, TB)
    acc = jnp.dot(wt_ref[...], xt_ref[...], preferred_element_type=jnp.float32)
    o_ref[...] = jnp.maximum(acc + b_ref[...], 0.0).astype(o_ref.dtype)


def _pick_tile(batch, tb_max):
    """Lane-dense batch tile: multiple of 128 (or == B), >=2 grid steps if possible."""
    if batch <= 128:
        return batch                      # one step, full-extent block (no 128 constraint)
    half = -(-batch // 2)                 # cdiv(B, 2): guarantee >=2 steps for v7x megacore
    return min(tb_max, ((half + 127) // 128) * 128)


def dict_like_model(input_dict, packed, *, tb_max=16384, min_kernel_batch=1024,
                    force_kernel=False):
    """Fused forward: relu(x1@W1+b1) ++ relu(x2@W2+b2)  ->  (B, 8)."""
    x1 = input_dict["tensor1"]
    x2 = input_dict["tensor2"]
    w_t, b_col = packed["w_t"], packed["b_col"]
    d_in1, d_in2 = packed["d_in1"], packed["d_in2"]
    out_dim, d_total = w_t.shape

    # Correctness guard: inputs must match the packing (review concern #1).
    assert x1.shape[1] == d_in1 and x2.shape[1] == d_in2, (
        f"input dims {x1.shape[1]}/{x2.shape[1]} != packed {d_in1}/{d_in2}")
    assert d_in1 + d_in2 == d_total
    assert x1.shape[0] == x2.shape[0]

    B = x1.shape[0]
    out_dtype = x1.dtype  # no wrapper upcast; bf16 in -> bf16 out, f32 accumulate on MXU

    # Tiny batches: one tile of real work is tens of ns; plain XLA fusion wins.
    if B < min_kernel_batch and not force_kernel:
        x_cat = jnp.concatenate([x1, x2], axis=-1)
        return jnp.maximum(x_cat @ w_t.T + b_col[:, 0], 0.0).astype(out_dtype)

    # One fused XLA copy: concat along features + transpose -> (d_total, B).
    # This is what makes every kernel operand lane-dense (batch on the lane axis).
    x_t = jnp.concatenate([x1, x2], axis=-1).T

    tb = _pick_tile(B, tb_max)
    grid = (pl.cdiv(B, tb),)              # ragged last block handled by Pallas; no pad/slice

    out_t = pl.pallas_call(
        _dict_like_kernel,
        out_shape=jax.ShapeDtypeStruct((out_dim, B), out_dtype),
        grid=grid,
        in_specs=[
            pl.BlockSpec((d_total, tb), lambda i: (0, i)),   # x^T tile, lane-dense
            pl.BlockSpec((out_dim, d_total), lambda i: (0, 0)),  # Wcat^T, DMA'd once
            pl.BlockSpec((out_dim, 1), lambda i: (0, 0)),        # bias column
        ],
        out_specs=pl.BlockSpec((out_dim, tb), lambda i: (0, i)),
        compiler_params=pltpu.CompilerParams(
            dimension_semantics=("parallel",)),
    )(x_t, w_t, b_col)

    # Back to the module's (B, 8) layout: a tiny (~32 B/row) pass; the consumer
    # could also take out_t (8, B) directly and skip it.
    return out_t.T


def init_params(key):
    # Deterministic synthetic init matching nn.Linear(10,3) / nn.Linear(10,5).
    # PyTorch stores weight as (out, in); we keep (in, out) for x @ W.
    k1, k2, k3, k4 = jax.random.split(key, 4)
    w1 = jax.random.uniform(k1, (10, 3), jnp.float32, -0.3, 0.3)
    b1 = jax.random.uniform(k2, (3,), jnp.float32, -0.3, 0.3)
    w2 = jax.random.uniform(k3, (10, 5), jnp.float32, -0.3, 0.3)
    b2 = jax.random.uniform(k4, (5,), jnp.float32, -0.3, 0.3)
    return {"w1": w1, "b1": b1, "w2": w2, "b2": b2}


def pack_params(params):
    """One-time repack: block-diagonal Wcat^T (8,20) + bias column (8,1)."""
    w1, b1, w2, b2 = params["w1"], params["b1"], params["w2"], params["b2"]
    d1, o1 = w1.shape
    d2, o2 = w2.shape
    w_cat = jnp.zeros((d1 + d2, o1 + o2), jnp.float32)
    w_cat = w_cat.at[:d1, :o1].set(w1)        # rows 0..d1-1, cols 0..o1-1  = W1
    w_cat = w_cat.at[d1:, o1:].set(w2)        # rows d1..,   cols o1..      = W2
    b_cat = jnp.concatenate([b1, b2])
    return {"w_t": w_cat.T, "b_col": b_cat[:, None], "d_in1": d1, "d_in2": d2}


def reference(input_dict, params):
    h1 = jnp.maximum(input_dict["tensor1"] @ params["w1"] + params["b1"], 0.0)
    h2 = jnp.maximum(input_dict["tensor2"] @ params["w2"] + params["b2"], 0.0)
    return jnp.concatenate([h1, h2], axis=-1)


if __name__ == "__main__":
    key = jax.random.PRNGKey(0)
    kp, kx1, kx2, kx3, kx4 = jax.random.split(key, 5)
    params = init_params(kp)
    packed = pack_params(params)

    # 1) Small batch, forced through the Pallas kernel (single full-extent block).
    B_small = 8
    small = {
        "tensor1": jax.random.normal(kx1, (B_small, 10), jnp.float32),
        "tensor2": jax.random.normal(kx2, (B_small, 10), jnp.float32),
    }
    out_s = jax.block_until_ready(dict_like_model(small, packed, force_kernel=True))
    ref_s = reference(small, params)
    assert out_s.shape == (B_small, 8), out_s.shape
    assert jnp.allclose(out_s, ref_s, atol=1e-5, rtol=1e-5), "small-batch mismatch"

    # 2) Non-multiple-of-128 batch: 2+ parallel grid steps and a ragged last block
    #    (no wrapper pad / slice).
    B_big = 300
    big = {
        "tensor1": jax.random.normal(kx3, (B_big, 10), jnp.float32),
        "tensor2": jax.random.normal(kx4, (B_big, 10), jnp.float32),
    }
    out_b = jax.block_until_ready(dict_like_model(big, packed, force_kernel=True))
    ref_b = reference(big, params)
    assert out_b.shape == (B_big, 8), out_b.shape
    assert jnp.allclose(out_b, ref_b, atol=1e-5, rtol=1e-5), "big-batch mismatch"

    print("KERNEL_OK")
</pallas_src>

<mosaic_0001>
module attributes {stable_mosaic.version = 11 : i64} {
  func.func @_dict_like_kernel(%arg0: i32, %arg1: memref<20x8xf32, #tpu.memory_space<vmem>>, %arg2: memref<8x20xf32, #tpu.memory_space<vmem>>, %arg3: memref<8x1xf32, #tpu.memory_space<vmem>>, %arg4: memref<8x8xf32, #tpu.memory_space<vmem>>) attributes {dimension_semantics = [#tpu.dimension_semantics<parallel>], iteration_bounds = array<i64: 1>, scalar_prefetch = 0 : i64, scratch_operands = 0 : i64, tpu.core_type = #tpu.core_type<tc>, window_params = [{transform_indices = @transform_0, window_bounds = array<i64: 20, 8>}, {pipeline_mode = #tpu.pipeline_mode<synchronous>, transform_indices = @transform_1, window_bounds = array<i64: 8, 20>}, {pipeline_mode = #tpu.pipeline_mode<synchronous>, transform_indices = @transform_2, window_bounds = array<i64: 8, 1>}, {transform_indices = @transform_3, window_bounds = array<i64: 8, 8>}]} {
    %c0 = arith.constant 0 : index
    %c0_0 = arith.constant 0 : index
    %0 = vector.load %arg2[%c0, %c0_0] : memref<8x20xf32, #tpu.memory_space<vmem>>, vector<8x20xf32>
    %c0_1 = arith.constant 0 : index
    %c0_2 = arith.constant 0 : index
    %1 = vector.load %arg1[%c0_1, %c0_2] : memref<20x8xf32, #tpu.memory_space<vmem>>, vector<20x8xf32>
    %cst = arith.constant dense<0.000000e+00> : vector<8x8xf32>
    %2 = tpu.matmul %0, %1, %cst {dimension_numbers = #tpu.dot_dimension_numbers<[1], [0], [0], [1], [0, 0, 1, 1], [], []>} : vector<8x20xf32>, vector<20x8xf32>, vector<8x8xf32> -> vector<8x8xf32>
    %c0_3 = arith.constant 0 : index
    %c0_4 = arith.constant 0 : index
    %3 = vector.load %arg3[%c0_3, %c0_4] : memref<8x1xf32, #tpu.memory_space<vmem>>, vector<8x1xf32>
    %4 = vector.broadcast %3 : vector<8x1xf32> to vector<8x8xf32>
    %5 = arith.addf %2, %4 : vector<8x8xf32>
    %cst_5 = arith.constant 0.000000e+00 : f32
    %6 = vector.broadcast %cst_5 : f32 to vector<8x8xf32>
    %7 = arith.maximumf %5, %6 : vector<8x8xf32>
    %c0_6 = arith.constant 0 : index
    %c0_7 = arith.constant 0 : index
    %8 = vector.load %arg4[%c0_6, %c0_7] : memref<8x8xf32, #tpu.memory_space<vmem>>, vector<8x8xf32>
    tpu.vector_store %arg4[%c0_6, %c0_7], %7 {strides = array<i32>} : memref<8x8xf32, #tpu.memory_space<vmem>>, vector<8x8xf32>,
    return
  }
  func.func @transform_0(%arg0: i32) -> (i32, i32) {
    %c0_i32 = arith.constant 0 : i32
    %c0_i32_0 = arith.constant 0 : i32
    return %c0_i32, %arg0 : i32, i32
  }
  func.func @transform_1(%arg0: i32) -> (i32, i32) {
    %c0_i32 = arith.constant 0 : i32
    %c0_i32_0 = arith.constant 0 : i32
    %c0_i32_1 = arith.constant 0 : i32
    return %c0_i32, %c0_i32_0 : i32, i32
  }
  func.func @transform_2(%arg0: i32) -> (i32, i32) {
    %c0_i32 = arith.constant 0 : i32
    %c0_i32_0 = arith.constant 0 : i32
    %c0_i32_1 = arith.constant 0 : i32
    return %c0_i32, %c0_i32_0 : i32, i32
  }
  func.func @transform_3(%arg0: i32) -> (i32, i32) {
    %c0_i32 = arith.constant 0 : i32
    %c0_i32_0 = arith.constant 0 : i32
    return %c0_i32, %arg0 : i32, i32
  }
}

</mosaic_0001>

<bundles_post_ra>
// kernel: tpu_custom_call.1
= control target key start
LH: loop header
LB: loop body
LE: loop exit
PB: predicated region body
PF: predicated region fallthrough
CT: control target
= control target key end

     0   :  { %vm29_vm0 = vcmask 1043456   ;;  %v162_v1 = vmov 0.0   ;;  %vm163_vm1 = vmmov 0   ;;  %s204_s0 = inlined_call_operand.vmem [shape: f32[20,8], index: 0, kind: input, shape index: {}]   ;;  %s205_s1 = inlined_call_operand.vmem [shape: f32[8,20], index: 1, kind: input, shape index: {}]   ;;  %s206_s2 = inlined_call_operand.vmem [shape: f32[8,1], index: 2, kind: input, shape index: {}]   ;;  %s207_s3 = inlined_call_operand.hbm [shape: f32[8,8], index: 3, kind: output, shape index: {}]  }
   0x1   :  { %v18_v0 = vld [vmem:[%s204_s0 + $0x10] sm:$0xf]  ;;  %126 = vmatprep.subr.mxu0 %v162_v1  ;;  %v17_v2 = vld [vmem:[%s204_s0 + $0x8] sm:$0xff]  ;;  %v19_v3 = vld [vmem:[%s206_s2] sm:$0xff]  ;;  %132 = vmatprep.mubr.msk.f32.mxu0 %vm163_vm1, %v162_v1 }
   0x2   :  { %127 = vmatpush3.msk.msra.mxu0 %vm29_vm0, %v18_v0 }
   0x3   :  { %8 = vsyncpa [#allocation3], 0  ;;  %128 = vmatprep.subr.mxu0 %v162_v1  ;;  %v16_v4 = vld [vmem:[%s204_s0] sm:$0xff]  ;;  %v164_v5 = vmov 0   ;;  %vm25_vm2 = vcmask 162816   ;;  %s165_s2 = smov [#allocation2]  }
   0x4   :  { %139 = vset.pattern.permute.xlu0 %v164_v5  ;;  %129 = vmatpush3.msra.mxu0 %v17_v2  ;;  %v15_v6 = vld [vmem:[%s205_s1] sm:$0xff]  ;;  %s112_s22 = sshll.u32 %s165_s2, 4  ;;  %vm104_vm3 = vcmask 64512   ;;  %s113_s22 = int_to_ptr.vmem [resolvable:$true] %s112_s22 }
   0x5   :  { %22 = vperm.xlu0 %139, %v19_v3   ;;  %130 = vmatprep.subr.mxu0 %v162_v1  ;;  %s140_s0 = scalar_lea.vmem %s113_s22, 128  ;;  %p145_p1 = scmp.lt.s32.totalorder %s113_s22, %s113_s22 }
   0x6   :  { %131 = vmatpush3.msra.mxu0 %v16_v4  ;;  %p141_p0 = scmp.ne.s32.totalorder %s113_s22, %s140_s0  ;;  %p146_p2 = scmp.lt.s32.totalorder %s140_s0, %s140_s0 }
   0x7   :  { %133 = vmatmul.mubr.msk.f32.vlgmr.msra.gmra.mxu0 %vm25_vm2, %v15_v6 }
   0x8   :  { %p147_p3 = por %p146_p2, %p145_p1 }
   0xa   :  { %p148_p4 = pnand %p147_p3, %p141_p0 }
  0x80   :  { %v23_v7 = vpop.permute.xlu0 %22 }
  0xc7   :  { %v99_v8 = vpop.f32.mrf.mxu0 }
  0xc8   :  { %v100_v9 = vadd.f32 %v99_v8, %v23_v7 }
  0xc9   :  { %v134_v10 = vpop.f32.mrf.mxu0 }
  0xca   :  { %v103_v11 = vmax.f32 %v100_v9, 0.0 }
  0xcc   :  { %105 = vst.msk [vmem:[#allocation2] sm:$0xff] %vm104_vm3, %v103_v11 }
  0xcd   :  { %151 = shalt.err (!%p148_p4)
}
  0xce   :  { %115 = dma.vmem_to_hbm [thread:$0]  %s113_s22, 128, %s207_s3, [#allocation3]  }
  0xcf   :  { %160 = dma.done.wait [#allocation3], 128  }
  0xd0   :  { %161 = vsyncadd [#allocation3], 4294967168 }
  0xd1   :  { %119 = vsyncpa [#allocation3], 1 }

</bundles_post_ra>
